<compile_context>
chip_gen: v7x
topology: tpu7x:2x2x1
jax: 0.10.0
libtpu: 0.0.40
codegen_flags: <defaults>
</compile_context>

<pallas_src>
import jax
import jax.numpy as jnp
from jax.experimental import pallas as pl
from jax.experimental.pallas import tpu as pltpu


LANE = 128
TARGET_ROW_TILE = 1024   # (1024, 128) f32 block = 512 KiB per buffer (well within VMEM)


def _round_up(x, m):
    return ((x + m - 1) // m) * m


def warmup_temp(x, B, C):
    """Elementwise y = B * (1 - exp(-x / C)) via a Pallas TPU kernel.

    x: any-shaped float array (e.g. NCHW). B, C: python scalars (module params).
    """
    orig_shape = x.shape
    orig_dtype = x.dtype

    # Stream f32 / bf16 natively through HBM (halves traffic for bf16 inputs);
    # widen anything else to f32. Compute is done in f32 inside the kernel
    # (safe on v5e, which has no bf16 VPU/EUP).
    if orig_dtype in (jnp.float32, jnp.bfloat16):
        stream_dtype = orig_dtype
    else:
        stream_dtype = jnp.float32
    sub = 8 if stream_dtype == jnp.float32 else 16   # min sublane multiple per dtype

    # Fold parameters at trace time: replace the per-element divide with a multiply.
    B_f = float(B)
    neg_inv_C = -1.0 / float(C)

    flat = x.reshape(-1).astype(stream_dtype)
    n = flat.shape[0]

    rows = pl.cdiv(n, LANE)
    rows_padded = _round_up(rows, sub)
    if rows_padded <= TARGET_ROW_TILE:
        row_tile = rows_padded          # small input: single grid step, no extra pad
    else:
        row_tile = TARGET_ROW_TILE
        rows_padded = _round_up(rows_padded, TARGET_ROW_TILE)

    total = rows_padded * LANE
    if total != n:
        # Pad tail with zeros (exp(0) is finite); padded region is discarded below.
        flat = jnp.pad(flat, (0, total - n))
    slab = flat.reshape(rows_padded, LANE)

    def kernel(x_ref, o_ref):
        xv = x_ref[...].astype(jnp.float32)
        y = B_f * (1.0 - jnp.exp(xv * neg_inv_C))
        o_ref[...] = y.astype(o_ref.dtype)

    grid = (rows_padded // row_tile,)

    out = pl.pallas_call(
        kernel,
        out_shape=jax.ShapeDtypeStruct((rows_padded, LANE), stream_dtype),
        grid=grid,
        in_specs=[pl.BlockSpec((row_tile, LANE), lambda i: (i, 0))],
        out_specs=pl.BlockSpec((row_tile, LANE), lambda i: (i, 0)),
        compiler_params=pltpu.CompilerParams(
            dimension_semantics=("parallel",),
        ),
    )(slab)

    out = out.reshape(-1)
    if total != n:
        out = out[:n]
    return out.reshape(orig_shape).astype(orig_dtype)


if __name__ == "__main__":
    key = jax.random.PRNGKey(0)

    # Deterministic parameter init (module __init__ takes A0 = [B, C]).
    B = 2.5
    C = 3.0

    # Small NCHW-shaped input, consistent with the generic elementwise forward.
    x = jax.random.uniform(key, (2, 4, 16, 16), dtype=jnp.float32) * 10.0

    y = warmup_temp(x, B, C)
    y = jax.block_until_ready(y)

    # Reference check in plain JAX.
    y_ref = B * (1.0 - jnp.exp(-x / C))
    assert jnp.allclose(y, y_ref, atol=1e-5, rtol=1e-5), "mismatch vs reference"

    print("KERNEL_OK")
</pallas_src>

<mosaic_0001>
module attributes {stable_mosaic.version = 11 : i64} {
  func.func @kernel(%arg0: i32, %arg1: memref<16x128xf32, #tpu.memory_space<vmem>>, %arg2: memref<16x128xf32, #tpu.memory_space<vmem>>) attributes {dimension_semantics = [#tpu.dimension_semantics<parallel>], iteration_bounds = array<i64: 1>, scalar_prefetch = 0 : i64, scratch_operands = 0 : i64, tpu.core_type = #tpu.core_type<tc>, window_params = [{transform_indices = @transform_0, window_bounds = array<i64: 16, 128>}, {transform_indices = @transform_1, window_bounds = array<i64: 16, 128>}]} {
    %c0 = arith.constant 0 : index
    %c0_0 = arith.constant 0 : index
    %0 = vector.load %arg1[%c0, %c0_0] : memref<16x128xf32, #tpu.memory_space<vmem>>, vector<16x128xf32>
    %cst = arith.constant -0.333333343 : f32
    %1 = vector.broadcast %cst : f32 to vector<16x128xf32>
    %2 = arith.mulf %0, %1 : vector<16x128xf32>
    %3 = math.exp %2 : vector<16x128xf32>
    %cst_1 = arith.constant 1.000000e+00 : f32
    %4 = vector.broadcast %cst_1 : f32 to vector<16x128xf32>
    %5 = arith.subf %4, %3 : vector<16x128xf32>
    %cst_2 = arith.constant 2.500000e+00 : f32
    %6 = vector.broadcast %cst_2 : f32 to vector<16x128xf32>
    %7 = arith.mulf %6, %5 : vector<16x128xf32>
    %c0_3 = arith.constant 0 : index
    %c0_4 = arith.constant 0 : index
    %8 = vector.load %arg2[%c0_3, %c0_4] : memref<16x128xf32, #tpu.memory_space<vmem>>, vector<16x128xf32>
    tpu.vector_store %arg2[%c0_3, %c0_4], %7 {strides = array<i32>} : memref<16x128xf32, #tpu.memory_space<vmem>>, vector<16x128xf32>,
    return
  }
  func.func @transform_0(%arg0: i32) -> (i32, i32) {
    %c0_i32 = arith.constant 0 : i32
    %c0_i32_0 = arith.constant 0 : i32
    return %arg0, %c0_i32 : i32, i32
  }
  func.func @transform_1(%arg0: i32) -> (i32, i32) {
    %c0_i32 = arith.constant 0 : i32
    %c0_i32_0 = arith.constant 0 : i32
    return %arg0, %c0_i32 : i32, i32
  }
}

</mosaic_0001>

<bundles_post_ra>
// kernel: tpu_custom_call.1
= control target key start
LH: loop header
LB: loop body
LE: loop exit
PB: predicated region body
PF: predicated region fallthrough
CT: control target
= control target key end

     0   :  { %6 = vsyncpa [#allocation3], 0  ;;  %s154_s0 = inlined_call_operand.hbm [shape: f32[16,128], index: 0, kind: input, shape index: {}]   ;;  %s155_s1 = inlined_call_operand.hbm [shape: f32[16,128], index: 1, kind: output, shape index: {}]  }
   0x1   :  { %7 = vsyncpa [#allocation4], 0  ;;  %s110_s6 = smov [#allocation2]   ;;  %s62_s10 = scalar_lea.hbm %s154_s0, 256 }
   0x2   :  { %s13_s7 = sshll.u32 %s110_s6, 4  ;;  %p63_p0 = scmp.ne.s32.totalorder %s154_s0, %s62_s10  ;;  %s14_s7 = int_to_ptr.vmem [resolvable:$true] %s13_s7 }
   0x3   :  { %p66_p1 = scmp.lt.u32.totalorder %s62_s10, %s154_s0 }
   0x5   :  { %p68_p2 = pnand %p66_p1, %p63_p0 }
   0x7   :  { %71 = shalt.err (!%p68_p2)
}
   0x8   :  { %s72_s15 = scalar_lea.vmem %s14_s7, 256  ;;  %p77_p4 = scmp.lt.s32.totalorder %s14_s7, %s14_s7 }
   0x9   :  { %p73_p3 = scmp.ne.s32.totalorder %s14_s7, %s72_s15  ;;  %p78_p5 = scmp.lt.s32.totalorder %s72_s15, %s72_s15 }
   0xb   :  { %p79_p6 = por %p78_p5, %p77_p4 }
   0xd   :  { %p80_p7 = pnand %p79_p6, %p73_p3 }
   0xf   :  { %83 = shalt.err (!%p80_p7)
}
  0x10   :  { %s111_s16 = smov 128   ;;  %s112_s17 = smov 8  }
  0x11   :  { %19 = dma.hbm_to_vmem [thread:$0]  %s154_s0, 256, %s14_s7, [#allocation3], %s111_s16, %s111_s16, %s112_s17  }
  0x12   :  { %106 = dma.done.wait [#allocation3], 256  }
  0x13   :  { %107 = vsyncadd [#allocation3], 4294967040  ;;  %v23_v0 = vld [vmem:[#allocation2] sm:$0xff]  ;;  %v24_v1 = vld [vmem:[#allocation2 + $0x8] sm:$0xff]  ;;  %s113_s20 = smov [#allocation5]  }
  0x14   :  { %v25_v2 = vmul.f32 -0.33333334, %v23_v0  ;;  %v26_v3 = vmul.f32 -0.33333334, %v24_v1  ;;  %s42_s21 = sshll.u32 %s113_s20, 4  ;;  %s43_s21 = int_to_ptr.vmem [resolvable:$true] %s42_s21 }
  0x15   :  { %s84_s0 = scalar_lea.vmem %s43_s21, 256  ;;  %p89_p9 = scmp.lt.s32.totalorder %s43_s21, %s43_s21 }
  0x16   :  { %v27_v4 = vmul.f32 1.442695, %v25_v2  ;;  %v29_v5 = vmul.f32 1.442695, %v26_v3  ;;  %p85_p8 = scmp.ne.s32.totalorder %s43_s21, %s84_s0  ;;  %p90_p10 = scmp.lt.s32.totalorder %s84_s0, %s84_s0 }
  0x18   :  { %58 = vpow2.f32 %v27_v4  ;;  %p91_p11 = por %p90_p10, %p89_p9 }
  0x19   :  { %60 = vpow2.f32 %v29_v5 }
  0x1a   :  { %p92_p12 = pnand %p91_p11, %p85_p8 }
  0x22   :  { %v59_v6 = vpop.eup %58 }
  0x23   :  { %v61_v7 = vpop.eup %60  ;;  %v31_v8 = vsub.f32 1.0, %v59_v6 }
  0x24   :  { %v32_v9 = vsub.f32 1.0, %v61_v7 }
  0x25   :  { %v33_v10 = vmul.f32 2.5, %v31_v8 }
  0x26   :  { %v34_v11 = vmul.f32 2.5, %v32_v9 }
  0x27   :  { %35 = vst [vmem:[#allocation5] sm:$0xff] %v33_v10 }
  0x28   :  { %36 = vst [vmem:[#allocation5 + $0x8] sm:$0xff] %v34_v11 }
  0x29   :  { %95 = shalt.err (!%p92_p12)
}
  0x2a   :  { %s96_s24 = scalar_lea.hbm %s155_s1, 256 }
  0x2b   :  { %p97_p13 = scmp.ne.s32.totalorder %s155_s1, %s96_s24  ;;  %p100_p0 = scmp.lt.u32.totalorder %s96_s24, %s155_s1 }
  0x2d   :  { %p102_p1 = pnand %p100_p0, %p97_p13 }
  0x2f   :  { %105 = shalt.err (!%p102_p1)
}
  0x30   :  { %48 = dma.vmem_to_hbm [thread:$0]  %s43_s21, 256, %s155_s1, [#allocation4], %s111_s16, %s111_s16, %s112_s17  }
  0x31   :  { %108 = dma.done.wait [#allocation4], 256  }
  0x32   :  { %109 = vsyncadd [#allocation4], 4294967040 }
  0x33   :  { %52 = vsyncpa [#allocation3], 1 }
  0x34   :  { %53 = vsyncpa [#allocation4], 1 }

</bundles_post_ra>
